<compile_context>
chip_gen: v7x
topology: tpu7x:2x2x1
jax: 0.10.0
libtpu: 0.0.40
codegen_flags: <defaults>
</compile_context>

<pallas_src>
import functools

import jax
import jax.numpy as jnp
from jax.experimental import pallas as pl
from jax.experimental.pallas import tpu as pltpu

LANES = 128            # vreg lane width
MAX_TILE_ROWS = 1024   # 1024 x 128 f32 = 512 KiB per input block


def _masked_mse_kernel(yh_ref, y_ref, m_ref, out_ref, acc_ref, *, inv_n):
    """Grid axis 0 is the sequential reduction over row tiles."""

    @pl.when(pl.program_id(0) == 0)
    def _init():
        acc_ref[...] = jnp.zeros_like(acc_ref)

    # Hot path: stays entirely in the vector-ALU slot.
    d = yh_ref[...].astype(jnp.float32) - y_ref[...].astype(jnp.float32)
    acc_ref[...] += d * d * m_ref[...].astype(jnp.float32)

    @pl.when(pl.program_id(0) == pl.num_programs(0) - 1)
    def _finalize():
        # Single cross-lane reduction + scalar SMEM store for the whole grid.
        out_ref[0, 0] = jnp.sum(acc_ref[...]) * jnp.float32(inv_n)


def masked_mse_loss(y_hat, y, label):
    """Pallas equivalent of MaskedMSELoss().forward(y_hat, y, label)."""
    assert y_hat.shape == y.shape, "MSELoss requires matching shapes"
    assert label.size == y_hat.size, "label must have the same element count"
    n_true = int(y_hat.size)

    # Flatten only (no wrapper-side dtype casts — cast in-register in kernel).
    yh = jnp.ravel(y_hat)
    yv = jnp.ravel(y)
    mv = jnp.ravel(label)

    # Lane-align (rare path; no-op for the shipped test shape).  Padded mask
    # entries are 0 so they contribute nothing; divisor stays n_true.
    pad = (-n_true) % LANES
    if pad:
        yh = jnp.concatenate([yh, jnp.zeros((pad,), yh.dtype)])
        yv = jnp.concatenate([yv, jnp.zeros((pad,), yv.dtype)])
        mv = jnp.concatenate([mv, jnp.zeros((pad,), mv.dtype)])
    rows = (n_true + pad) // LANES

    # Row tile: whole slab if small (single grid step), else big 1024-row
    # tiles.  3 inputs x 2 buffers x 512 KiB + 512 KiB accumulator ≈ 3.5 MiB,
    # comfortably inside the scoped VMEM limit on v5e/v6e/v7x.
    if rows <= MAX_TILE_ROWS:
        tile_rows = rows
    else:
        tile_rows = MAX_TILE_ROWS
        rpad = (-rows) % tile_rows
        if rpad:
            yh = jnp.concatenate([yh, jnp.zeros((rpad * LANES,), yh.dtype)])
            yv = jnp.concatenate([yv, jnp.zeros((rpad * LANES,), yv.dtype)])
            mv = jnp.concatenate([mv, jnp.zeros((rpad * LANES,), mv.dtype)])
            rows += rpad

    yh2 = yh.reshape(rows, LANES)
    yv2 = yv.reshape(rows, LANES)
    mv2 = mv.reshape(rows, LANES)

    grid = (rows // tile_rows,)
    inv_n = 1.0 / float(max(n_true, 1))  # guard against n == 0
    kernel = functools.partial(_masked_mse_kernel, inv_n=inv_n)

    # TODO(synk): on v7x a leading "parallel" grid axis of size 2 (one partial
    # sum per TensorCore, combined outside the kernel) would use both cores;
    # omitted to keep the single scalar-output structure simple.
    out = pl.pallas_call(
        kernel,
        out_shape=jax.ShapeDtypeStruct((1, 1), jnp.float32),
        grid_spec=pltpu.PrefetchScalarGridSpec(
            num_scalar_prefetch=0,
            grid=grid,
            in_specs=[
                pl.BlockSpec((tile_rows, LANES), lambda i: (i, 0)),
                pl.BlockSpec((tile_rows, LANES), lambda i: (i, 0)),
                pl.BlockSpec((tile_rows, LANES), lambda i: (i, 0)),
            ],
            out_specs=pl.BlockSpec(memory_space=pltpu.SMEM),
            scratch_shapes=[pltpu.VMEM((tile_rows, LANES), jnp.float32)],
        ),
        compiler_params=pltpu.CompilerParams(
            dimension_semantics=("arbitrary",)  # sequential reduction axis
        ),
    )(yh2, yv2, mv2)

    return out[0, 0]  # scalar, matching torch's 0-dim loss


if __name__ == "__main__":
    key = jax.random.PRNGKey(0)
    k1, k2, k3 = jax.random.split(key, 3)

    shape = (2, 4, 16, 16)  # NCHW-style prediction / target / mask
    y_hat = jax.random.normal(k1, shape, dtype=jnp.float32)
    y = jax.random.normal(k2, shape, dtype=jnp.float32)
    label = (jax.random.uniform(k3, shape) > 0.5).astype(jnp.float32)

    loss = masked_mse_loss(y_hat, y, label)
    loss = jax.block_until_ready(loss)

    ref = jnp.mean(((y_hat - y) ** 2).reshape(-1) * label.reshape(-1))
    assert jnp.allclose(loss, ref, rtol=1e-5, atol=1e-6), (loss, ref)

    print("KERNEL_OK")
</pallas_src>

<mosaic_0001>
module attributes {stable_mosaic.version = 11 : i64} {
  func.func @_masked_mse_kernel(%arg0: i32, %arg1: memref<16x128xf32, #tpu.memory_space<vmem>>, %arg2: memref<16x128xf32, #tpu.memory_space<vmem>>, %arg3: memref<16x128xf32, #tpu.memory_space<vmem>>, %arg4: memref<1x1xf32, #tpu.memory_space<smem>>, %arg5: memref<16x128xf32, #tpu.memory_space<vmem>>) attributes {dimension_semantics = [#tpu.dimension_semantics<arbitrary>], iteration_bounds = array<i64: 1>, scalar_prefetch = 0 : i64, scratch_operands = 1 : i64, tpu.core_type = #tpu.core_type<tc>, window_params = [{transform_indices = @transform_0, window_bounds = array<i64: 16, 128>}, {transform_indices = @transform_1, window_bounds = array<i64: 16, 128>}, {transform_indices = @transform_2, window_bounds = array<i64: 16, 128>}, {transform_indices = @transform_3, window_bounds = array<i64: 1, 1>}]} {
    %c0_i32 = arith.constant 0 : i32
    %0 = arith.cmpi eq, %arg0, %c0_i32 : i32
    %1 = arith.extui %0 : i1 to i32
    %c0_i32_0 = arith.constant 0 : i32
    %2 = arith.cmpi ne, %1, %c0_i32_0 : i32
    scf.if %2 {
      %cst = arith.constant 0.000000e+00 : f32
      %15 = vector.broadcast %cst : f32 to vector<16x128xf32>
      %c0_12 = arith.constant 0 : index
      %c0_13 = arith.constant 0 : index
      %16 = vector.load %arg5[%c0_12, %c0_13] : memref<16x128xf32, #tpu.memory_space<vmem>>, vector<16x128xf32>
      tpu.vector_store %arg5[%c0_12, %c0_13], %15 {strides = array<i32>} : memref<16x128xf32, #tpu.memory_space<vmem>>, vector<16x128xf32>,
    } else {
    }
    %c0 = arith.constant 0 : index
    %c0_1 = arith.constant 0 : index
    %3 = vector.load %arg1[%c0, %c0_1] : memref<16x128xf32, #tpu.memory_space<vmem>>, vector<16x128xf32>
    %c0_2 = arith.constant 0 : index
    %c0_3 = arith.constant 0 : index
    %4 = vector.load %arg2[%c0_2, %c0_3] : memref<16x128xf32, #tpu.memory_space<vmem>>, vector<16x128xf32>
    %5 = arith.subf %3, %4 : vector<16x128xf32>
    %c0_4 = arith.constant 0 : index
    %c0_5 = arith.constant 0 : index
    %6 = vector.load %arg5[%c0_4, %c0_5] : memref<16x128xf32, #tpu.memory_space<vmem>>, vector<16x128xf32>
    %7 = arith.mulf %5, %5 : vector<16x128xf32>
    %c0_6 = arith.constant 0 : index
    %c0_7 = arith.constant 0 : index
    %8 = vector.load %arg3[%c0_6, %c0_7] : memref<16x128xf32, #tpu.memory_space<vmem>>, vector<16x128xf32>
    %9 = arith.mulf %7, %8 : vector<16x128xf32>
    %10 = arith.addf %6, %9 : vector<16x128xf32>
    %c0_8 = arith.constant 0 : index
    %c0_9 = arith.constant 0 : index
    %11 = vector.load %arg5[%c0_8, %c0_9] : memref<16x128xf32, #tpu.memory_space<vmem>>, vector<16x128xf32>
    tpu.vector_store %arg5[%c0_8, %c0_9], %10 {strides = array<i32>} : memref<16x128xf32, #tpu.memory_space<vmem>>, vector<16x128xf32>,
    %c0_i32_10 = arith.constant 0 : i32
    %12 = arith.cmpi eq, %arg0, %c0_i32_10 : i32
    %13 = arith.extui %12 : i1 to i32
    %c0_i32_11 = arith.constant 0 : i32
    %14 = arith.cmpi ne, %13, %c0_i32_11 : i32
    scf.if %14 {
      %c0_12 = arith.constant 0 : index
      %c0_13 = arith.constant 0 : index
      %15 = vector.load %arg5[%c0_12, %c0_13] : memref<16x128xf32, #tpu.memory_space<vmem>>, vector<16x128xf32>
      %16 = vector.shape_cast %15 : vector<16x128xf32> to vector<1x16x128xf32>
      %cst = arith.constant dense<0.000000e+00> : vector<1xf32>
      %17 = vector.multi_reduction <add>, %16, %cst [1, 2] : vector<1x16x128xf32> to vector<1xf32>
      %18 = vector.shape_cast %17 : vector<1xf32> to vector<1x1x1xf32>
      %19 = vector.extract %18[0, 0, 0] : f32 from vector<1x1x1xf32>
      %cst_14 = arith.constant 4.8828125E-4 : f32
      %20 = arith.mulf %19, %cst_14 : f32
      %c0_15 = arith.constant 0 : index
      %c0_16 = arith.constant 0 : index
      %21 = memref.load %arg4[%c0_15, %c0_16] : memref<1x1xf32, #tpu.memory_space<smem>>
      memref.store %20, %arg4[%c0_15, %c0_16] : memref<1x1xf32, #tpu.memory_space<smem>>
    } else {
    }
    return
  }
  func.func @transform_0(%arg0: i32) -> (i32, i32) {
    %c0_i32 = arith.constant 0 : i32
    %c0_i32_0 = arith.constant 0 : i32
    return %arg0, %c0_i32 : i32, i32
  }
  func.func @transform_1(%arg0: i32) -> (i32, i32) {
    %c0_i32 = arith.constant 0 : i32
    %c0_i32_0 = arith.constant 0 : i32
    return %arg0, %c0_i32 : i32, i32
  }
  func.func @transform_2(%arg0: i32) -> (i32, i32) {
    %c0_i32 = arith.constant 0 : i32
    %c0_i32_0 = arith.constant 0 : i32
    return %arg0, %c0_i32 : i32, i32
  }
  func.func @transform_3(%arg0: i32) -> (i32, i32) {
    %c0_i32 = arith.constant 0 : i32
    %c0_i32_0 = arith.constant 0 : i32
    %c0_i32_1 = arith.constant 0 : i32
    return %c0_i32, %c0_i32_0 : i32, i32
  }
}

</mosaic_0001>

<bundles_post_ra>
// kernel: tpu_custom_call.1
= control target key start
LH: loop header
LB: loop body
LE: loop exit
PB: predicated region body
PF: predicated region fallthrough
CT: control target
= control target key end

     0   :  { %8 = vsyncpa [#allocation4], 0  ;;  %s293_s0 = inlined_call_operand.hbm [shape: f32[16,128], index: 0, kind: input, shape index: {}]   ;;  %s294_s1 = inlined_call_operand.hbm [shape: f32[16,128], index: 1, kind: input, shape index: {}]   ;;  %s295_s2 = inlined_call_operand.hbm [shape: f32[16,128], index: 2, kind: input, shape index: {}]   ;;  %s296_s3 = inlined_call_operand.hbm [shape: f32[1,1], index: 3, kind: output, shape index: {}]  }
   0x1   :  { %9 = vsyncpa [#allocation7], 0 }
   0x2   :  { %10 = vsyncpa [#allocation5], 0  ;;  %s203_s12 = smov [#allocation6]   ;;  %s204_s14 = smov [#allocation3]  }
   0x3   :  { %s28_s13 = sshll.u32 %s203_s12, 4  ;;  %s16_s15 = sshll.u32 %s204_s14, 4  ;;  %s29_s13 = int_to_ptr.vmem [resolvable:$true] %s28_s13  ;;  %s229_s15 = int_to_ptr.vmem [resolvable:$true] %s16_s15 }
   0x4   :  { %s121_s18 = scalar_lea.hbm %s294_s1, 256 }
   0x5   :  { %p122_p0 = scmp.ne.s32.totalorder %s294_s1, %s121_s18  ;;  %p125_p1 = scmp.lt.u32.totalorder %s121_s18, %s294_s1 }
   0x7   :  { %p127_p2 = pnand %p125_p1, %p122_p0 }
   0x9   :  { %130 = shalt.err (!%p127_p2)
}
   0xa   :  { %s131_s23 = scalar_lea.vmem %s29_s13, 256  ;;  %p136_p4 = scmp.lt.s32.totalorder %s29_s13, %s29_s13 }
   0xb   :  { %p132_p3 = scmp.ne.s32.totalorder %s29_s13, %s131_s23  ;;  %p137_p5 = scmp.lt.s32.totalorder %s131_s23, %s131_s23 }
   0xd   :  { %p138_p6 = por %p137_p5, %p136_p4 }
   0xf   :  { %p139_p7 = pnand %p138_p6, %p132_p3 }
  0x11   :  { %142 = shalt.err (!%p139_p7)
}
  0x12   :  { %s205_s24 = smov 128   ;;  %s206_s25 = smov 8  }
  0x13   :  { %34 = dma.hbm_to_vmem [thread:$0]  %s294_s1, 256, %s29_s13, [#allocation7], %s205_s24, %s205_s24, %s206_s25  }
  0x14   :  { %s143_s30 = scalar_lea.hbm %s293_s0, 256 }
  0x15   :  { %p144_p8 = scmp.ne.s32.totalorder %s293_s0, %s143_s30  ;;  %p147_p9 = scmp.lt.u32.totalorder %s143_s30, %s293_s0 }
  0x17   :  { %p149_p10 = pnand %p147_p9, %p144_p8 }
  0x19   :  { %152 = shalt.err (!%p149_p10)
}
  0x1a   :  { %s153_s8 = scalar_lea.vmem %s229_s15, 256  ;;  %p158_p12 = scmp.lt.s32.totalorder %s229_s15, %s229_s15 }
  0x1b   :  { %p154_p11 = scmp.ne.s32.totalorder %s229_s15, %s153_s8  ;;  %p159_p13 = scmp.lt.s32.totalorder %s153_s8, %s153_s8 }
  0x1d   :  { %p160_p0 = por %p159_p13, %p158_p12 }
  0x1f   :  { %p161_p1 = pnand %p160_p0, %p154_p11 }
  0x21   :  { %164 = shalt.err (!%p161_p1)
}
  0x22   :  { %22 = dma.hbm_to_vmem [thread:$0]  %s293_s0, 256, %s229_s15, [#allocation4], %s205_s24, %s205_s24, %s206_s25  }
  0x23   :  { %s207_s10 = smov [#allocation8]   ;;  %s165_s14 = scalar_lea.hbm %s295_s2, 256 }
  0x24   :  { %s40_s11 = sshll.u32 %s207_s10, 4  ;;  %p166_p2 = scmp.ne.s32.totalorder %s295_s2, %s165_s14  ;;  %s41_s11 = int_to_ptr.vmem [resolvable:$true] %s40_s11 }
  0x25   :  { %p169_p3 = scmp.lt.u32.totalorder %s165_s14, %s295_s2 }
  0x27   :  { %p171_p4 = pnand %p169_p3, %p166_p2 }
  0x29   :  { %174 = shalt.err (!%p171_p4)
}
  0x2a   :  { %s175_s20 = scalar_lea.vmem %s41_s11, 256  ;;  %p180_p6 = scmp.lt.s32.totalorder %s41_s11, %s41_s11 }
  0x2b   :  { %p176_p5 = scmp.ne.s32.totalorder %s41_s11, %s175_s20  ;;  %p181_p7 = scmp.lt.s32.totalorder %s175_s20, %s175_s20 }
  0x2d   :  { %p182_p8 = por %p181_p7, %p180_p6 }
  0x2f   :  { %p183_p9 = pnand %p182_p8, %p176_p5 }
  0x31   :  { %186 = shalt.err (!%p183_p9)
}
  0x32   :  { %46 = dma.hbm_to_vmem [thread:$0]  %s295_s2, 256, %s41_s11, [#allocation7], %s205_s24, %s205_s24, %s206_s25  }
  0x33   :  { %197 = dma.done.wait [#allocation4], 256  }
  0x34   :  { %198 = vsyncadd [#allocation4], 4294967040 }
  0x35   :  { %199 = dma.done.wait [#allocation7], 512  }
  0x36   :  { %200 = vsyncadd [#allocation7], 4294966784  ;;  %v62_v0 = vld [vmem:[#allocation3] sm:$0xff]  ;;  %v63_v1 = vld [vmem:[#allocation3 + $0x8] sm:$0xff]  ;;  %s187_s24 = scalar_lea.hbm %s296_s3, 16 }
  0x37   :  { %v64_v2 = vld [vmem:[#allocation6] sm:$0xff]  ;;  %v65_v3 = vld [vmem:[#allocation6 + $0x8] sm:$0xff]  ;;  %v72_v6 = vld [vmem:[#allocation8] sm:$0xff]  ;;  %p188_p10 = scmp.ne.s32.totalorder %s296_s3, %s187_s24  ;;  %p191_p11 = scmp.lt.u32.totalorder %s187_s24, %s296_s3 }
  0x38   :  { %v66_v4 = vsub.f32 %v62_v0, %v64_v2  ;;  %v67_v5 = vsub.f32 %v63_v1, %v65_v3  ;;  %v73_v8 = vld [vmem:[#allocation8 + $0x8] sm:$0xff] }
  0x39   :  { %p193_p12 = pnand %p191_p11, %p188_p10 }
  0x3a   :  { %v70_v7 = vmul.f32 %v66_v4, %v66_v4  ;;  %v71_v9 = vmul.f32 %v67_v5, %v67_v5 }
  0x3c   :  { %v74_v10 = vmul.f32 %v72_v6, %v70_v7  ;;  %v75_v11 = vmul.f32 %v73_v8, %v71_v9 }
  0x3e   :  { %v85_v12 = vadd.f32 %v75_v11, %v74_v10 }
  0x40   :  { %86 = vadd.xlane.f32.xlu0 %v85_v12 }
  0xcd   :  { %v87_v13 = vpop.xlane.xlu0 %86 }
  0xce   :  { %v88_v14 = vrot.slane %v87_v13, 4 }
  0xd0   :  { %v89_v15 = vadd.f32 %v88_v14, %v87_v13 }
  0xd2   :  { %v90_v16 = vrot.slane %v89_v15, 2 }
  0xd4   :  { %v91_v17 = vadd.f32 %v90_v16, %v89_v15 }
  0xd6   :  { %v92_v18 = vrot.slane %v91_v17, 1 }
  0xd8   :  { %v93_v19 = vadd.f32 %v92_v18, %v91_v17 }
  0xda   :  { %113 = vpush %v93_v19 }
 0x10b   :  { %s114_s2 = spop %113 }
 0x10c   :  { %s95_s21 = smul.f32 0.00048828125, %s114_s2 }
 0x10e   :  { %97 = sst [smem:[#allocation9]] %s95_s21 }
 0x10f   :  { %196 = shalt.err (!%p193_p12)
}
 0x110   :  { %s208_s29 = smov [#allocation9]  }
 0x111   :  { %105 = dma.smem_to_hbm %s208_s29, 16, %s296_s3, [#allocation5]  }
 0x112   :  { %201 = dma.done.wait [#allocation5], 16  }
 0x113   :  { %202 = vsyncadd [#allocation5], 4294967280 }
 0x114   :  { %109 = sfence }
 0x115   :  { %110 = vsyncpa [#allocation4], 1 }
 0x116   :  { %111 = vsyncpa [#allocation7], 1 }
 0x117   :  { %112 = vsyncpa [#allocation5], 1 }

</bundles_post_ra>
